<compile_context>
chip_gen: v5e
topology: v5e:2x2
jax: 0.10.0
libtpu: 0.0.40
codegen_flags: <defaults>
</compile_context>

<pallas_src>
import jax
import jax.numpy as jnp
from jax.experimental import pallas as pl
from jax.experimental.pallas import tpu as pltpu


def _prelu_shared_kernel(alpha_ref, x_ref, o_ref):
    # alpha_ref: SMEM scalar-prefetch ref, shape (1,), f32.
    # x_ref / o_ref: (tm, tn) VMEM tiles.
    x = x_ref[...]
    a = alpha_ref[0].astype(x.dtype)          # scalar; no whole-tile f32 promotion
    o_ref[...] = jnp.where(x > 0, x, a * x)


def _prelu_channel_kernel(x_ref, a_ref, o_ref):
    # x_ref / o_ref: (tm, tn) VMEM tiles; a_ref: (tm, 1) per-row alpha column.
    x = x_ref[...]
    a = a_ref[...]                             # broadcasts over the lane dim
    o_ref[...] = jnp.where(x > 0, x, a * x)


def _sublane_multiple(dtype):
    # Sub-32-bit dtypes pack along sublanes: 8 for f32, 16 for bf16, 32 for i8.
    return max(8, 32 // jnp.dtype(dtype).itemsize)


def _pick_lane_view(total):
    # Largest "nice" lane extent (multiple of 128) that divides the element count.
    for cand in (16384, 8192, 4096, 2048, 1024, 512, 256, 128):
        if total % cand == 0:
            return cand
    return None


def _tile_2d(rows, lanes, itemsize, sublane, target_block_bytes):
    # Lane tile: multiple of 128 when the lane extent allows, else full extent.
    if lanes % 128 == 0:
        max_tn = max(128, (target_block_bytes // (sublane * itemsize)) // 128 * 128)
        tn = min(lanes, max_tn)
    else:
        tn = lanes  # TODO(synk): non-128-multiple H*W with per-channel alpha keeps masked stores.
    # Row tile: fill up to ~target_block_bytes, rounded to the sublane pack.
    tm = max(1, target_block_bytes // max(1, tn * itemsize))
    if tm >= rows:
        tm = rows
    else:
        tm = max(sublane, (tm // sublane) * sublane)
        tm = min(tm, rows)
    # v7x megacore: make sure the grid has >= 2 steps when the data allows it.
    if pl.cdiv(rows, tm) * pl.cdiv(lanes, tn) < 2:
        if rows >= 2 * sublane:
            tm = ((pl.cdiv(rows, 2) + sublane - 1) // sublane) * sublane
        elif lanes % 256 == 0 and lanes >= 256:
            tn = max(128, ((lanes // 2) // 128) * 128)
    return tm, tn


def _vmem_limit(block_bytes):
    # ~4x block (double-buffered in + out) + slack; clamp to [16 MiB, 64 MiB]
    # so it is valid on every generation (v7x physical VMEM is 64 MiB).
    return int(min(64 << 20, max(4 * block_bytes + (4 << 20), 16 << 20)))


def prelu_pallas(x, weight, *, target_block_bytes=2 * 1024 * 1024):
    """PReLU forward: y = x if x > 0 else alpha * x (matches nn.PReLU).

    x:      (N, C, H, W) array (NCHW, like PyTorch).
    weight: (num_parameters,) alphas; num_parameters must be 1 or C.
    """
    N, C, H, W = x.shape
    itemsize = jnp.dtype(x.dtype).itemsize
    sublane = _sublane_multiple(x.dtype)
    num_params = int(weight.size)
    if num_params not in (1, C):
        raise ValueError("num_parameters must be 1 or C")

    total = N * C * H * W
    cost = pl.CostEstimate(
        flops=3 * total,                      # cmp + mul + select per element
        transcendentals=0,
        bytes_accessed=2 * total * itemsize,  # read x + write y (alpha negligible)
    )

    if num_params == 1:
        # ---- Shared alpha: lane-dense slab view + scalar-prefetch alpha. ----
        lanes = _pick_lane_view(total)
        if lanes is None:
            rows, lanes = N * C, H * W        # fallback: channel-row view
        else:
            rows = total // lanes
        x2 = x.reshape(rows, lanes)
        tm, tn = _tile_2d(rows, lanes, itemsize, sublane, target_block_bytes)
        grid = (pl.cdiv(rows, tm), pl.cdiv(lanes, tn))
        alpha_scalar = jnp.asarray(weight, jnp.float32).reshape(1)

        out2 = pl.pallas_call(
            _prelu_shared_kernel,
            out_shape=jax.ShapeDtypeStruct((rows, lanes), x.dtype),
            grid_spec=pltpu.PrefetchScalarGridSpec(
                num_scalar_prefetch=1,
                grid=grid,
                in_specs=[pl.BlockSpec((tm, tn), lambda i, j, a: (i, j))],
                out_specs=pl.BlockSpec((tm, tn), lambda i, j, a: (i, j)),
            ),
            compiler_params=pltpu.CompilerParams(
                dimension_semantics=("parallel", "parallel"),
                vmem_limit_bytes=_vmem_limit(tm * tn * itemsize),
            ),
            cost_estimate=cost,
        )(alpha_scalar, x2)
        return out2.reshape(N, C, H, W)

    # ---- Per-channel alpha: (N*C, H*W) view + (N*C, 1) alpha column. ----
    rows, lanes = N * C, H * W
    x2 = x.reshape(rows, lanes)
    alpha = jnp.broadcast_to(
        weight.astype(x.dtype).reshape(1, C), (N, C)
    ).reshape(rows, 1)
    tm, tn = _tile_2d(rows, lanes, itemsize, sublane, target_block_bytes)
    grid = (pl.cdiv(rows, tm), pl.cdiv(lanes, tn))

    out2 = pl.pallas_call(
        _prelu_channel_kernel,
        out_shape=jax.ShapeDtypeStruct((rows, lanes), x.dtype),
        grid=grid,
        in_specs=[
            pl.BlockSpec((tm, tn), lambda i, j: (i, j)),
            pl.BlockSpec((tm, 1), lambda i, j: (i, 0)),
        ],
        out_specs=pl.BlockSpec((tm, tn), lambda i, j: (i, j)),
        compiler_params=pltpu.CompilerParams(
            dimension_semantics=("parallel", "parallel"),
            vmem_limit_bytes=_vmem_limit(tm * tn * itemsize),
        ),
        cost_estimate=cost,
    )(x2, alpha)
    return out2.reshape(N, C, H, W)


if __name__ == "__main__":
    key = jax.random.PRNGKey(0)

    # Small NCHW input consistent with a conv-style activation.
    x = jax.random.normal(key, (2, 4, 16, 16), dtype=jnp.float32)

    # 1) Module defaults: num_parameters=1, init=0.25 (shared alpha path).
    w_shared = jnp.full((1,), 0.25, dtype=jnp.float32)
    y_shared = jax.block_until_ready(prelu_pallas(x, w_shared))
    ref_shared = jnp.where(x > 0, x, 0.25 * x)
    assert y_shared.shape == x.shape and y_shared.dtype == x.dtype
    assert jnp.allclose(y_shared, ref_shared, atol=1e-6, rtol=1e-6)

    # 2) Per-channel alpha path (num_parameters = C).
    w_chan = jnp.linspace(0.1, 0.4, 4, dtype=jnp.float32)
    y_chan = jax.block_until_ready(prelu_pallas(x, w_chan))
    ref_chan = jnp.where(x > 0, x, w_chan.reshape(1, 4, 1, 1) * x)
    assert y_chan.shape == x.shape and y_chan.dtype == x.dtype
    assert jnp.allclose(y_chan, ref_chan, atol=1e-6, rtol=1e-6)

    print("KERNEL_OK")
</pallas_src>

<mosaic_0001>
module attributes {stable_mosaic.version = 11 : i64} {
  func.func @_prelu_shared_kernel(%arg0: i32, %arg1: i32, %arg2: memref<1xf32, #tpu.memory_space<smem>>, %arg3: memref<1x1024xf32, #tpu.memory_space<vmem>>, %arg4: memref<1x1024xf32, #tpu.memory_space<vmem>>) attributes {dimension_semantics = [#tpu.dimension_semantics<parallel>, #tpu.dimension_semantics<parallel>], iteration_bounds = array<i64: 1, 2>, scalar_prefetch = 1 : i64, scratch_operands = 0 : i64, tpu.core_type = #tpu.core_type<tc>, window_params = [{transform_indices = @transform_0, window_bounds = array<i64: 1, 1024>}, {transform_indices = @transform_1, window_bounds = array<i64: 1, 1024>}]} {
    %c0 = arith.constant 0 : index
    %c0_0 = arith.constant 0 : index
    %0 = vector.load %arg3[%c0, %c0_0] : memref<1x1024xf32, #tpu.memory_space<vmem>>, vector<1x1024xf32>
    %c0_1 = arith.constant 0 : index
    %1 = memref.load %arg2[%c0_1] : memref<1xf32, #tpu.memory_space<smem>>
    %cst = arith.constant 0.000000e+00 : f32
    %2 = vector.broadcast %cst : f32 to vector<1x1024xf32>
    %3 = arith.cmpf ogt, %0, %2 : vector<1x1024xf32>
    %4 = vector.broadcast %1 : f32 to vector<1x1024xf32>
    %5 = arith.mulf %4, %0 : vector<1x1024xf32>
    %6 = arith.select %3, %0, %5 : vector<1x1024xi1>, vector<1x1024xf32>
    %c0_2 = arith.constant 0 : index
    %c0_3 = arith.constant 0 : index
    %7 = vector.load %arg4[%c0_2, %c0_3] : memref<1x1024xf32, #tpu.memory_space<vmem>>, vector<1x1024xf32>
    tpu.vector_store %arg4[%c0_2, %c0_3], %6 {strides = array<i32>} : memref<1x1024xf32, #tpu.memory_space<vmem>>, vector<1x1024xf32>,
    return
  }
  func.func @transform_0(%arg0: i32, %arg1: i32, %arg2: memref<1xf32, #tpu.memory_space<smem>>) -> (i32, i32) {
    %c0_i32 = arith.constant 0 : i32
    return %arg0, %arg1 : i32, i32
  }
  func.func @transform_1(%arg0: i32, %arg1: i32, %arg2: memref<1xf32, #tpu.memory_space<smem>>) -> (i32, i32) {
    %c0_i32 = arith.constant 0 : i32
    return %arg0, %arg1 : i32, i32
  }
}

</mosaic_0001>

<bundles_post_ra>
// kernel: tpu_custom_call.1
= control target key start
LH: loop header
LB: loop body
LE: loop exit
PB: predicated region body
PF: predicated region fallthrough
CT: control target
= control target key end

     0   :  { %s590_s0 = inlined_call_operand.<no memory space> [shape: f32[1], index: 0, kind: input, shape index: {}]   ;;  %s591_s1 = inlined_call_operand.hbm [shape: f32[1,2048], index: 1, kind: input, shape index: {}]   ;;  %s592_s2 = inlined_call_operand.hbm [shape: f32[1,2048], index: 2, kind: output, shape index: {}]  }
   0x1   :  { %7 = sst [smem:[#allocation3]] %s590_s0 }
   0x2   :  { %8 = vsyncpa [#allocation5], 0 }
   0x3   :  { %10 = vsyncpa [#allocation5 + $0x1], 0 }
   0x4   :  { %11 = vsyncpa [#allocation6], 0 }
   0x5   :  { %13 = vsyncpa [#allocation6 + $0x1], 0  ;;  %s470_s11 = smov 0   ;;  %s472_s12 = smov 0  }
   0x6   :  { %s474_s13 = smov 0   ;;  %s476_s14 = smov 0  }
   0x7   :  { %s478_s15 = smov 0   ;;  %s480_s16 = smov 0  }
   0x8 LB: > { %s263_s0 = sadd.s32 4294967295, %s450_s16   ;;  %s264_s17 = sadd.s32 4294967294, %s450_s16   ;;  %s450_s16 = sphi %s480_s16, %s19_s16   ;;  %s446_s15 = sphi %s478_s15, %s601_s15   ;;  %s442_s14 = sphi %s476_s14, %s600_s14   ;;  %s438_s13 = sphi %s474_s13, %s599_s13   ;;  %s434_s12 = sphi %s472_s12, %s598_s12   ;;  %s430_s11 = sphi %s470_s11, %s597_s11  }
   0x9   : > { %s28_s18 = sadd.s32 1, %s446_s15  ;;  %s40_s19 = sadd.s32 1, %s438_s13 }
   0xa   : > { %p29_p0 = scmp.ge.s32.totalorder %s28_s18, 2  ;;  %p47_p1 = scmp.ne.s32.totalorder %s438_s13, %s434_s12 }
   0xb   : > { %p48_p2 = scmp.eq.s32.totalorder %s450_s16, 0  ;;  %p53_p3 = scmp.ne.s32.totalorder %s434_s12, %s430_s11 }
   0xc   : > { %s603_s18 = smov (%p29_p0, %s28_s18), 0  ;;  %p54_p5 = scmp.eq.s32.totalorder %s263_s0, 0 }
   0xd   : > { %p511_p4 = por %p48_p2, %p47_p1  ;;  %s36_s21 = ssub.s32 %s446_s15, %s603_s18 }
   0xe   : > { %p79_p6 = scmp.eq.s32.totalorder %s263_s0, 1  ;;  %p38_p7 = scmp.eq.s32.totalorder %s36_s21, 0 }
   0xf   : > { %p517_p8 = por %p54_p5, %p53_p3  ;;  %p85_p10 = scmp.eq.s32.totalorder %s264_s17, 1 }
  0x10   : > { %p521_p9 = por %p79_p6, %p47_p1  ;;  %p266_p12 = scmp.ge.s32.totalorder %s450_s16, 2 }
  0x11   : > { %s526_s24 = scalar_select %p38_p7, %s438_s13, %s40_s19  }
  0x12   : > { %p528_p11 = por %p85_p10, %p53_p3  ;;  %p288_p13 = scmp.lt.s32.totalorder %s450_s16, 2 }
  0x13   : > { %s105_s26 = sand.u32 1, %s438_s13   ;;  %s268_s28 = sshll.u32 %s446_s15, 3 }
  0x14   : > { %s267_s27 = sshll.u32 %s105_s26, 3  ;;  %s115_s3 = scalar_lea.hbm %s591_s1, %s268_s28 }
  0x15   : > { %s109_s4 = scalar_lea.vmem [#allocation4], %s267_s27  ;;  %s117_s6 = sshll.u32 %s115_s3, 4  ;;  %s118_s6 = int_to_ptr.hbm [resolvable:$true] %s117_s6 }
  0x16   : > { %s119_s5 = sshll.u32 %s109_s4, 4  ;;  %p281_p0 = pnand %p288_p13, %p511_p4  ;;  %s120_s5 = int_to_ptr.vmem [resolvable:$true] %s119_s5 }
  0x17   : > { %p269_p1 = scmp.ge.s32.totalorder %s450_s16, 1  ;;  %p124_p2 = scmp.lt.s32.totalorder %s450_s16, 3 }
  0x18   : > { %s106_s7 = scalar_lea.sflag [#allocation5], %s105_s26 }
  0x19   : > { %283 = dma.hbm_to_vmem [thread:$0]  (!%p281_p0), %s118_s6, 128, %s120_s5, %s106_s7  }
  0x1a   : > { %p125_p3 = pnand %p269_p1, %p124_p2 }
  0x1b   : > { %s544_s8 = sand.u32 (!%p125_p3), 1, %s434_s12  }
  0x1c   : > { %128 = sbr.rel (%p125_p3) target bundleno = 49 (0x31), region = 24  ;;  %s270_s9 = sshll.u32 (!%p125_p3), %s544_s8, 3 }
  0x1d   : > { %s131_s10 = scalar_lea.sflag (!%p125_p3), [#allocation5], %s544_s8  ;;  %s134_s0 = scalar_lea.vmem (!%p125_p3), [#allocation4], %s270_s9 }
  0x21   : > { %421 = dma.done.wait (%p517_p8), %s131_s10, 128  }
  0x22   : > { %423 = vsyncadd (%p517_p8), %s131_s10, 4294967168  ;;  %s157_s17 = sld [smem:[#allocation3]]  ;;  %s273_s19 = sshll.u32 %s442_s14, 3  ;;  %v156_v1 = vld [vmem:[%s134_s0] sm:$0xff] }
  0x23   : > { %s176_s26 = scalar_lea.hbm %s592_s2, %s273_s19  ;;  %s153_s27 = scalar_lea.vmem [#allocation7], %s270_s9  ;;  %vm158_vm0 = vcmp.gt.f32.partialorder %v156_v1, 0.0 }
  0x24   : > { %s178_s28 = sshll.u32 %s153_s27, 4  ;;  %s180_s29 = sshll.u32 %s176_s26, 4  ;;  %s179_s28 = int_to_ptr.vmem [resolvable:$true] %s178_s28  ;;  %s181_s29 = int_to_ptr.hbm [resolvable:$true] %s180_s29 }
  0x25   : > { %s164_s22 = scalar_lea.sflag [#allocation6], %s544_s8  ;;  %s382_s30 = sshra.s32 %s181_s29, 4  ;;  %s383_s30 = int_to_ptr.hbm [resolvable:$true] %s382_s30 }
  0x26   : > { %s384_s14 = scalar_lea.hbm %s383_s30, 8  ;;  %s388_s5 = scalar_lea.hbm %s592_s2, 16 }
  0x27   : > { %p385_p4 = scmp.ne.s32.totalorder %s383_s30, %s384_s14  ;;  %p389_p7 = scmp.lt.s32.totalorder %s383_s30, %s592_s2 }
  0x28   : > { %v159_v0 = vstv %s157_s17  ;;  %p390_p8 = scmp.lt.s32.totalorder %s388_s5, %s384_s14 }
  0x29   : > { %v160_v2 = vmul.f32 %v159_v0, %v156_v1  ;;  %p386_p5 = pnand %p385_p4, %p521_p9 }
  0x2a   : > { %p391_p10 = por %p390_p8, %p389_p7 }
  0x2b   : > { %v161_v3 = vsel %vm158_vm0, %v156_v1, %v160_v2  ;;  %p387_p6 = pneg %p386_p5 }
  0x2c   : > { %162 = vst [vmem:[%s153_s27] sm:$0xff] %v161_v3 }
  0x2d   : > { %p392_p13 = pnand %p391_p10, %p387_p6 }
  0x2f   : > { %395 = shalt.err (!%p392_p13)
}
  0x30   : > { %278 = dma.vmem_to_hbm [thread:$0]  (%p521_p9), %s179_s28, 128, %s181_s29, %s164_s22  }
  0x31 PF: > { %s192_s8 = sand.u32 1, %s430_s11   ;;  %p285_p0 = pnand %p266_p12, %p528_p11 }
  0x32   : > { %s193_s9 = scalar_lea.sflag [#allocation6], %s192_s8 }
  0x33   : > { %p286_p1 = pneg %p285_p0 }
  0x35   : > { %425 = dma.done.wait (%p286_p1), %s193_s9, 128  }
  0x36   : > { %427 = vsyncadd (%p286_p1), %s193_s9, 4294967168  ;;  %s19_s16 = sadd.s32 1, %s450_s16   ;;  %s597_s11 = smov %s434_s12 }
  0x37   : > { %p16_p2 = scmp.ge.s32.totalorder %s19_s16, 4   ;;  %s598_s12 = smov %s438_s13 }
  0x38   : > { %s599_s13 = smov %s526_s24  ;;  %s600_s14 = smov %s446_s15 }
  0x39   : > { %s601_s15 = smov %s603_s18  ;;  %18 = sbr.rel (!%p16_p2) target bundleno = 8 (0x8), region = 69 }
  0x3e   :  { %199 = vsyncpa [#allocation5], 1 }
  0x3f   :  { %201 = vsyncpa [#allocation5 + $0x1], 1 }
  0x40   :  { %202 = vsyncpa [#allocation6], 1 }
  0x41   :  { %204 = vsyncpa [#allocation6 + $0x1], 1 }

</bundles_post_ra>
